<compile_context>
chip_gen: v7x
topology: tpu7x:2x2x1
jax: 0.10.0
libtpu: 0.0.40
codegen_flags: <defaults>
</compile_context>

<pallas_src>
import jax
import jax.numpy as jnp
from jax.experimental import pallas as pl
from jax.experimental.pallas import tpu as pltpu

_R = 8  # row-packing factor: 8 samples per packed row (one f32 sublane group)


def _round_up(x, m):
    return ((x + m - 1) // m) * m


def _mlp_kernel(x_ref, w1_ref, b1_ref, w2_ref, b2_ref, wh_ref, bh_ref,
                h_ref, p_ref):
    """Fused 2-hidden-layer MLP + sigmoid head for one row-packed batch tile.

    Shapes (R = 8 samples packed per row):
      x_ref:  (TBp, R*F)
      w1_ref: (R*F,  R*H1)   b1_ref: (1, R*H1)     (block-diagonal packed)
      w2_ref: (R*H1, R*H2)   b2_ref: (1, R*H2)
      wh_ref: (R*H2, R)      bh_ref: (1, R)
      h_ref:  (TBp, R*H2)    row-packed last hidden representation (post-ReLU)
      p_ref:  (TBp, R)       row-packed sigmoid probabilities
    """
    x = x_ref[...]

    # hidden layer 1: linear + relu  (dropout = identity in eval mode)
    a1 = jnp.dot(x, w1_ref[...], preferred_element_type=jnp.float32) + b1_ref[...]
    a1 = jnp.maximum(a1, 0.0)

    # hidden layer 2: linear + relu
    a2 = jnp.dot(a1, w2_ref[...], preferred_element_type=jnp.float32) + b2_ref[...]
    a2 = jnp.maximum(a2, 0.0)

    # lane-dense writeback of the hidden representation (optionally bf16)
    h_ref[...] = a2.astype(h_ref.dtype)

    # head: packed block-diagonal column matmul on the MXU (K=R*H2, N=R),
    # f32 accumulation, then sigmoid on the EUP.
    z = jnp.dot(a2, wh_ref[...], preferred_element_type=jnp.float32) + bh_ref[...]
    p_ref[...] = jax.nn.sigmoid(z)


def _pack_params(params):
    """Row-pack weights/biases into 8x block-diagonal / tiled form."""
    R = _R
    eye = jnp.eye(R, dtype=jnp.float32)
    w1p = jnp.kron(eye, params["w1"])          # (R*F,  R*H1)
    b1p = jnp.tile(params["b1"], (1, R))       # (1, R*H1)
    w2p = jnp.kron(eye, params["w2"])          # (R*H1, R*H2)
    b2p = jnp.tile(params["b2"], (1, R))       # (1, R*H2)
    whp = jnp.kron(eye, params["wh"].T)        # (R*H2, R)
    bhp = jnp.tile(params["bh"], (1, R))       # (1, R)
    return w1p, b1p, w2p, b2p, whp, bhp


def _choose_tile(B, tb_max):
    """Pick a batch tile (multiple of 128 rows) and the padded batch size."""
    tb_max = max(128, _round_up(int(tb_max), 128))
    tb = min(tb_max, _round_up(max(int(B), 1), 128))
    # v7x megacore: prefer >= 2 grid blocks when the batch allows it so the
    # "parallel" batch axis actually shards across both TensorCores.
    if tb > 128 and _round_up(B, tb) // tb == 1:
        tb = max(128, _round_up((tb + 1) // 2, 128))
    b_pad = _round_up(B, tb)
    return tb, b_pad


def mlp_forward(x, params, *, tb_max=8192, h_dtype=jnp.float32):
    """Run the batch-tiled, row-packed fused Pallas MLP kernel.

    x: (B, n_features) float32
    params: dict with w1 (F,H1), b1 (1,H1), w2 (H1,H2), b2 (1,H2),
            wh (1,H2), bh (1,1)
    h_dtype: dtype for the hidden-representation output (jnp.bfloat16 halves
             the dominant HBM writeback stream on v6e/v7x).
    returns (h, probs) with shapes (B, H2) and (B, 1); probs is always f32.
    """
    B, F = x.shape
    H1 = params["w1"].shape[1]
    H2 = params["w2"].shape[1]
    R = _R

    tb, b_pad = _choose_tile(B, tb_max)
    if b_pad != B:
        x = jnp.pad(x, ((0, b_pad - B), (0, 0)))
    num_blocks = b_pad // tb
    tbp = tb // R                       # packed rows per tile (multiple of 16)

    # Row-pack: 8 consecutive samples per row -> lane-dense buffers.  This is
    # a free row-major reshape (contiguous in HBM).
    x_packed = x.reshape(b_pad // R, R * F)
    w1p, b1p, w2p, b2p, whp, bhp = _pack_params(params)

    h_bytes = jnp.dtype(h_dtype).itemsize
    weight_bytes = 4 * (w1p.size + b1p.size + w2p.size + b2p.size
                        + whp.size + bhp.size)
    cost = pl.CostEstimate(
        flops=2 * b_pad * R * (F * H1 + H1 * H2 + H2),  # MXU flops incl. packed zeros
        transcendentals=b_pad,                           # one sigmoid per sample
        bytes_accessed=b_pad * (4 * F + h_bytes * H2 + 4) + weight_bytes,
    )

    out_shapes = (
        jax.ShapeDtypeStruct((b_pad // R, R * H2), h_dtype),   # row-packed h
        jax.ShapeDtypeStruct((b_pad // R, R), jnp.float32),    # row-packed probs
    )

    h_packed, p_packed = pl.pallas_call(
        _mlp_kernel,
        out_shape=out_shapes,
        grid=(num_blocks,),
        in_specs=[
            pl.BlockSpec((tbp, R * F), lambda i: (i, 0)),      # x: streamed per tile
            pl.BlockSpec((R * F, R * H1), lambda i: (0, 0)),   # packed weights resident
            pl.BlockSpec((1, R * H1), lambda i: (0, 0)),
            pl.BlockSpec((R * H1, R * H2), lambda i: (0, 0)),
            pl.BlockSpec((1, R * H2), lambda i: (0, 0)),
            pl.BlockSpec((R * H2, R), lambda i: (0, 0)),       # packed head weight
            pl.BlockSpec((1, R), lambda i: (0, 0)),
        ],
        out_specs=(
            pl.BlockSpec((tbp, R * H2), lambda i: (i, 0)),
            pl.BlockSpec((tbp, R), lambda i: (i, 0)),
        ),
        compiler_params=pltpu.CompilerParams(
            dimension_semantics=("parallel",),          # megacore on v7x
            vmem_limit_bytes=32 * 1024 * 1024,          # see arithmetic in header
        ),
        cost_estimate=cost,
    )(x_packed, w1p, b1p, w2p, b2p, whp, bhp)

    # Un-pack (free reshapes) and drop batch padding.
    h = h_packed.reshape(b_pad, H2)[:B]
    probs = p_packed.reshape(b_pad, 1)[:B]
    return h, probs


def init_params(key, n_features, mlp_layers):
    """Deterministic PyTorch-Linear-style init: U(-1/sqrt(fan_in), 1/sqrt(fan_in)).

    Hidden weights are stored as (in_features, out_features) so the kernel does
    x @ W; the head weight is stored as a (1, H_last) row.
    """
    dims = [n_features] + list(mlp_layers)
    params = {}
    keys = jax.random.split(key, 2 * len(dims))

    for li, (fi, fo) in enumerate(zip(dims[:-1], dims[1:])):
        bound = 1.0 / jnp.sqrt(jnp.float32(fi))
        kw, kb = keys[2 * li], keys[2 * li + 1]
        params[f"w{li + 1}"] = jax.random.uniform(
            kw, (fi, fo), jnp.float32, -bound, bound)
        params[f"b{li + 1}"] = jax.random.uniform(
            kb, (1, fo), jnp.float32, -bound, bound)

    fi = dims[-1]
    bound = 1.0 / jnp.sqrt(jnp.float32(fi))
    kw, kb = keys[-2], keys[-1]
    params["wh"] = jax.random.uniform(kw, (1, fi), jnp.float32, -bound, bound)
    params["bh"] = jax.random.uniform(kb, (1, 1), jnp.float32, -bound, bound)
    return params


def _reference_forward(x, params):
    """Pure-JAX reference (mirrors the PyTorch forward in eval mode)."""
    a = jnp.maximum(x @ params["w1"] + params["b1"], 0.0)
    a = jnp.maximum(a @ params["w2"] + params["b2"], 0.0)
    h = a
    probs = jax.nn.sigmoid(
        jnp.sum(a * params["wh"], axis=-1, keepdims=True) + params["bh"])
    return h, probs


if __name__ == "__main__":
    # Model config consistent with suggest_hyperparameters: hidden dims [32, 64]
    n_features = 16
    mlp_layers = [32, 64]

    key = jax.random.PRNGKey(0)
    k_params, k_x1, k_x2 = jax.random.split(key, 3)
    params = init_params(k_params, n_features, mlp_layers)

    # 1) small batch: single grid block (batch padded 8 -> 128 inside wrapper)
    x1 = jax.random.normal(k_x1, (8, n_features), dtype=jnp.float32)
    h1, p1 = mlp_forward(x1, params)
    h1 = jax.block_until_ready(h1)
    p1 = jax.block_until_ready(p1)
    h1_ref, p1_ref = _reference_forward(x1, params)
    assert h1.shape == (8, mlp_layers[-1]) and p1.shape == (8, 1)
    assert jnp.allclose(h1, h1_ref, atol=1e-4, rtol=1e-4)
    assert jnp.allclose(p1, p1_ref, atol=1e-4, rtol=1e-4)

    # 2) multi-block grid + batch-padding path (force tb=128: 300 -> 3 blocks)
    x2 = jax.random.normal(k_x2, (300, n_features), dtype=jnp.float32)
    h2, p2 = mlp_forward(x2, params, tb_max=128)
    h2 = jax.block_until_ready(h2)
    p2 = jax.block_until_ready(p2)
    h2_ref, p2_ref = _reference_forward(x2, params)
    assert h2.shape == (300, mlp_layers[-1]) and p2.shape == (300, 1)
    assert jnp.allclose(h2, h2_ref, atol=1e-4, rtol=1e-4)
    assert jnp.allclose(p2, p2_ref, atol=1e-4, rtol=1e-4)

    # 3) default tiling (>=2 blocks via megacore split) + bf16 h streaming
    h3, p3 = mlp_forward(x2, params, h_dtype=jnp.bfloat16)
    h3 = jax.block_until_ready(h3)
    p3 = jax.block_until_ready(p3)
    assert h3.shape == (300, mlp_layers[-1]) and h3.dtype == jnp.bfloat16
    assert jnp.allclose(h3.astype(jnp.float32), h2_ref, atol=2e-2, rtol=2e-2)
    assert jnp.allclose(p3, p2_ref, atol=1e-4, rtol=1e-4)  # probs stay f32

    print("KERNEL_OK")
</pallas_src>

<mosaic_0001>
module attributes {stable_mosaic.version = 11 : i64} {
  func.func @_mlp_kernel(%arg0: i32, %arg1: memref<16x128xf32, #tpu.memory_space<vmem>>, %arg2: memref<128x256xf32, #tpu.memory_space<vmem>>, %arg3: memref<1x256xf32, #tpu.memory_space<vmem>>, %arg4: memref<256x512xf32, #tpu.memory_space<vmem>>, %arg5: memref<1x512xf32, #tpu.memory_space<vmem>>, %arg6: memref<512x8xf32, #tpu.memory_space<vmem>>, %arg7: memref<1x8xf32, #tpu.memory_space<vmem>>, %arg8: memref<16x512xf32, #tpu.memory_space<vmem>>, %arg9: memref<16x8xf32, #tpu.memory_space<vmem>>) attributes {dimension_semantics = [#tpu.dimension_semantics<parallel>], iteration_bounds = array<i64: 1>, scalar_prefetch = 0 : i64, scratch_operands = 0 : i64, tpu.core_type = #tpu.core_type<tc>, window_params = [{transform_indices = @transform_0, window_bounds = array<i64: 16, 128>}, {pipeline_mode = #tpu.pipeline_mode<synchronous>, transform_indices = @transform_1, window_bounds = array<i64: 128, 256>}, {pipeline_mode = #tpu.pipeline_mode<synchronous>, transform_indices = @transform_2, window_bounds = array<i64: 1, 256>}, {pipeline_mode = #tpu.pipeline_mode<synchronous>, transform_indices = @transform_3, window_bounds = array<i64: 256, 512>}, {pipeline_mode = #tpu.pipeline_mode<synchronous>, transform_indices = @transform_4, window_bounds = array<i64: 1, 512>}, {pipeline_mode = #tpu.pipeline_mode<synchronous>, transform_indices = @transform_5, window_bounds = array<i64: 512, 8>}, {pipeline_mode = #tpu.pipeline_mode<synchronous>, transform_indices = @transform_6, window_bounds = array<i64: 1, 8>}, {transform_indices = @transform_7, window_bounds = array<i64: 16, 512>}, {transform_indices = @transform_8, window_bounds = array<i64: 16, 8>}]} {
    %c0 = arith.constant 0 : index
    %c0_0 = arith.constant 0 : index
    %0 = vector.load %arg1[%c0, %c0_0] : memref<16x128xf32, #tpu.memory_space<vmem>>, vector<16x128xf32>
    %c0_1 = arith.constant 0 : index
    %c0_2 = arith.constant 0 : index
    %1 = vector.load %arg2[%c0_1, %c0_2] : memref<128x256xf32, #tpu.memory_space<vmem>>, vector<128x256xf32>
    %cst = arith.constant dense<0.000000e+00> : vector<16x256xf32>
    %2 = tpu.matmul %0, %1, %cst {dimension_numbers = #tpu.dot_dimension_numbers<[1], [0], [0], [1], [0, 0, 1, 1], [], []>} : vector<16x128xf32>, vector<128x256xf32>, vector<16x256xf32> -> vector<16x256xf32>
    %c0_3 = arith.constant 0 : index
    %c0_4 = arith.constant 0 : index
    %3 = vector.load %arg3[%c0_3, %c0_4] : memref<1x256xf32, #tpu.memory_space<vmem>>, vector<1x256xf32>
    %4 = vector.broadcast %3 : vector<1x256xf32> to vector<16x256xf32>
    %5 = arith.addf %2, %4 : vector<16x256xf32>
    %cst_5 = arith.constant 0.000000e+00 : f32
    %6 = vector.broadcast %cst_5 : f32 to vector<16x256xf32>
    %7 = arith.maximumf %5, %6 : vector<16x256xf32>
    %c0_6 = arith.constant 0 : index
    %c0_7 = arith.constant 0 : index
    %8 = vector.load %arg4[%c0_6, %c0_7] : memref<256x512xf32, #tpu.memory_space<vmem>>, vector<256x512xf32>
    %cst_8 = arith.constant dense<0.000000e+00> : vector<16x512xf32>
    %9 = tpu.matmul %7, %8, %cst_8 {dimension_numbers = #tpu.dot_dimension_numbers<[1], [0], [0], [1], [0, 0, 1, 1], [], []>} : vector<16x256xf32>, vector<256x512xf32>, vector<16x512xf32> -> vector<16x512xf32>
    %c0_9 = arith.constant 0 : index
    %c0_10 = arith.constant 0 : index
    %10 = vector.load %arg5[%c0_9, %c0_10] : memref<1x512xf32, #tpu.memory_space<vmem>>, vector<1x512xf32>
    %11 = vector.broadcast %10 : vector<1x512xf32> to vector<16x512xf32>
    %12 = arith.addf %9, %11 : vector<16x512xf32>
    %cst_11 = arith.constant 0.000000e+00 : f32
    %13 = vector.broadcast %cst_11 : f32 to vector<16x512xf32>
    %14 = arith.maximumf %12, %13 : vector<16x512xf32>
    %c0_12 = arith.constant 0 : index
    %c0_13 = arith.constant 0 : index
    %15 = vector.load %arg8[%c0_12, %c0_13] : memref<16x512xf32, #tpu.memory_space<vmem>>, vector<16x512xf32>
    tpu.vector_store %arg8[%c0_12, %c0_13], %14 {strides = array<i32>} : memref<16x512xf32, #tpu.memory_space<vmem>>, vector<16x512xf32>,
    %c0_14 = arith.constant 0 : index
    %c0_15 = arith.constant 0 : index
    %16 = vector.load %arg6[%c0_14, %c0_15] : memref<512x8xf32, #tpu.memory_space<vmem>>, vector<512x8xf32>
    %cst_16 = arith.constant dense<0.000000e+00> : vector<16x8xf32>
    %17 = tpu.matmul %14, %16, %cst_16 {dimension_numbers = #tpu.dot_dimension_numbers<[1], [0], [0], [1], [0, 0, 1, 1], [], []>} : vector<16x512xf32>, vector<512x8xf32>, vector<16x8xf32> -> vector<16x8xf32>
    %c0_17 = arith.constant 0 : index
    %c0_18 = arith.constant 0 : index
    %18 = vector.load %arg7[%c0_17, %c0_18] : memref<1x8xf32, #tpu.memory_space<vmem>>, vector<1x8xf32>
    %19 = vector.broadcast %18 : vector<1x8xf32> to vector<16x8xf32>
    %20 = arith.addf %17, %19 : vector<16x8xf32>
    %21 = arith.negf %20 : vector<16x8xf32>
    %22 = math.exp %21 : vector<16x8xf32>
    %cst_19 = arith.constant 1.000000e+00 : f32
    %23 = vector.broadcast %cst_19 : f32 to vector<16x8xf32>
    %24 = arith.addf %23, %22 : vector<16x8xf32>
    %25 = arith.divf %23, %24 : vector<16x8xf32>
    %c0_20 = arith.constant 0 : index
    %c0_21 = arith.constant 0 : index
    %26 = vector.load %arg9[%c0_20, %c0_21] : memref<16x8xf32, #tpu.memory_space<vmem>>, vector<16x8xf32>
    tpu.vector_store %arg9[%c0_20, %c0_21], %25 {strides = array<i32>} : memref<16x8xf32, #tpu.memory_space<vmem>>, vector<16x8xf32>,
    return
  }
  func.func @transform_0(%arg0: i32) -> (i32, i32) {
    %c0_i32 = arith.constant 0 : i32
    %c0_i32_0 = arith.constant 0 : i32
    return %arg0, %c0_i32 : i32, i32
  }
  func.func @transform_1(%arg0: i32) -> (i32, i32) {
    %c0_i32 = arith.constant 0 : i32
    %c0_i32_0 = arith.constant 0 : i32
    %c0_i32_1 = arith.constant 0 : i32
    return %c0_i32, %c0_i32_0 : i32, i32
  }
  func.func @transform_2(%arg0: i32) -> (i32, i32) {
    %c0_i32 = arith.constant 0 : i32
    %c0_i32_0 = arith.constant 0 : i32
    %c0_i32_1 = arith.constant 0 : i32
    return %c0_i32, %c0_i32_0 : i32, i32
  }
  func.func @transform_3(%arg0: i32) -> (i32, i32) {
    %c0_i32 = arith.constant 0 : i32
    %c0_i32_0 = arith.constant 0 : i32
    %c0_i32_1 = arith.constant 0 : i32
    return %c0_i32, %c0_i32_0 : i32, i32
  }
  func.func @transform_4(%arg0: i32) -> (i32, i32) {
    %c0_i32 = arith.constant 0 : i32
    %c0_i32_0 = arith.constant 0 : i32
    %c0_i32_1 = arith.constant 0 : i32
    return %c0_i32, %c0_i32_0 : i32, i32
  }
  func.func @transform_5(%arg0: i32) -> (i32, i32) {
    %c0_i32 = arith.constant 0 : i32
    %c0_i32_0 = arith.constant 0 : i32
    %c0_i32_1 = arith.constant 0 : i32
    return %c0_i32, %c0_i32_0 : i32, i32
  }
  func.func @transform_6(%arg0: i32) -> (i32, i32) {
    %c0_i32 = arith.constant 0 : i32
    %c0_i32_0 = arith.constant 0 : i32
    %c0_i32_1 = arith.constant 0 : i32
    return %c0_i32, %c0_i32_0 : i32, i32
  }
  func.func @transform_7(%arg0: i32) -> (i32, i32) {
    %c0_i32 = arith.constant 0 : i32
    %c0_i32_0 = arith.constant 0 : i32
    return %arg0, %c0_i32 : i32, i32
  }
  func.func @transform_8(%arg0: i32) -> (i32, i32) {
    %c0_i32 = arith.constant 0 : i32
    %c0_i32_0 = arith.constant 0 : i32
    return %arg0, %c0_i32 : i32, i32
  }
}

</mosaic_0001>

<bundles_post_ra>
// kernel: tpu_custom_call.1
= control target key start
LH: loop header
LB: loop body
LE: loop exit
PB: predicated region body
PF: predicated region fallthrough
CT: control target
= control target key end

     0   :  { %14 = vsyncpa [#allocation3], 0  ;;  %s1596_s0 = inlined_call_operand.vmem [shape: f32[16,128], index: 0, kind: input, shape index: {}]   ;;  %s1597_s1 = inlined_call_operand.vmem [shape: f32[128,256], index: 1, kind: input, shape index: {}]   ;;  %s1598_s2 = inlined_call_operand.vmem [shape: f32[1,256], index: 2, kind: input, shape index: {}]   ;;  %s1599_s3 = inlined_call_operand.hbm [shape: f32[256,512], index: 3, kind: input, shape index: {}]   ;;  %s1600_s4 = inlined_call_operand.vmem [shape: f32[1,512], index: 4, kind: input, shape index: {}]   ;;  %s1601_s5 = inlined_call_operand.vmem [shape: f32[512,8], index: 5, kind: input, shape index: {}]   ;;  %s1602_s6 = inlined_call_operand.vmem [shape: f32[1,8], index: 6, kind: input, shape index: {}]   ;;  %s1603_s7 = inlined_call_operand.hbm [shape: f32[16,512], index: 7, kind: output, shape index: {0}]   ;;  %s1604_s8 = inlined_call_operand.vmem [shape: f32[16,8], index: 8, kind: output, shape index: {1}]  }
   0x1   :  { %15 = vsyncpa [#allocation4], 0  ;;  %s1127_s27 = smov [#allocation2]   ;;  %s1079_s9 = scalar_lea.hbm %s1599_s3, 16384 }
   0x2   :  { %s27_s28 = sshll.u32 %s1127_s27, 4  ;;  %p1080_p0 = scmp.ne.s32.totalorder %s1599_s3, %s1079_s9  ;;  %s28_s28 = int_to_ptr.vmem [resolvable:$true] %s27_s28 }
   0x3   :  { %p1083_p1 = scmp.lt.u32.totalorder %s1079_s9, %s1599_s3 }
   0x5   :  { %p1085_p2 = pnand %p1083_p1, %p1080_p0 }
   0x7   :  { %1088 = shalt.err (!%p1085_p2)
}
   0x8   :  { %s1089_s14 = scalar_lea.vmem %s28_s28, 16384  ;;  %p1094_p4 = scmp.lt.s32.totalorder %s28_s28, %s28_s28 }
   0x9   :  { %p1090_p3 = scmp.ne.s32.totalorder %s28_s28, %s1089_s14  ;;  %p1095_p5 = scmp.lt.s32.totalorder %s1089_s14, %s1089_s14 }
   0xb   :  { %p1096_p6 = por %p1095_p5, %p1094_p4 }
   0xd   :  { %p1097_p7 = pnand %p1096_p6, %p1090_p3 }
   0xf   :  { %1100 = shalt.err (!%p1097_p7)
}
  0x10   :  { %s1128_s15 = smov 512   ;;  %s1129_s16 = smov 32  }
  0x11   :  { %33 = dma.hbm_to_vmem [thread:$0]  %s1599_s3, 16384, %s28_s28, [#allocation3], %s1128_s15, %s1128_s15, %s1129_s16  }
  0x12   :  { %1123 = dma.done.wait [#allocation3], 16384  }
  0x13   :  { %1124 = vsyncadd [#allocation3], 4294950912  ;;  %v1130_v0 = vmov 0.0   ;;  %v46_v1 = vld [vmem:[%s1597_s1 + $0x8] sm:$0xff]  ;;  %v48_v2 = vld [vmem:[%s1597_s1 + $0x18] sm:$0xff] }
  0x14   :  { %153 = vmatprep.mubr.f32.mxu0 %v1130_v0  ;;  %v45_v3 = vld [vmem:[%s1597_s1] sm:$0xff]  ;;  %v826_v4 = vpack.c.bf16 %v48_v2, %v46_v1  ;;  %v47_v5 = vld [vmem:[%s1597_s1 + $0x10] sm:$0xff]  ;;  %v50_v6 = vld [vmem:[%s1597_s1 + $0x28] sm:$0xff] }
  0x15   :  { %v52_v7 = vld [vmem:[%s1597_s1 + $0x38] sm:$0xff]  ;;  %v828_v8 = vpack.c.bf16 %v47_v5, %v45_v3  ;;  %v49_v10 = vld [vmem:[%s1597_s1 + $0x20] sm:$0xff]  ;;  %v51_v11 = vld [vmem:[%s1597_s1 + $0x30] sm:$0xff] }
  0x16   :  { %v830_v9 = vpack.c.bf16 %v52_v7, %v50_v6  ;;  %v54_v12 = vld [vmem:[%s1597_s1 + $0x48] sm:$0xff]  ;;  %827 = vmatprep.subr.bf16.mxu0 %v826_v4  ;;  %v56_v13 = vld [vmem:[%s1597_s1 + $0x58] sm:$0xff]  ;;  %v832_v14 = vpack.c.bf16 %v51_v11, %v49_v10  ;;  %v53_v16 = vld [vmem:[%s1597_s1 + $0x40] sm:$0xff] }
  0x17   :  { %829 = vmatpush1.bf16.msra.mxu0 %v828_v8  ;;  %v834_v15 = vpack.c.bf16 %v56_v13, %v54_v12  ;;  %v55_v17 = vld [vmem:[%s1597_s1 + $0x50] sm:$0xff]  ;;  %v58_v18 = vld [vmem:[%s1597_s1 + $0x68] sm:$0xff]  ;;  %v60_v19 = vld [vmem:[%s1597_s1 + $0x78] sm:$0xff] }
  0x18   :  { %831 = vmatprep.subr.bf16.mxu0 %v830_v9  ;;  %v836_v20 = vpack.c.bf16 %v55_v17, %v53_v16  ;;  %v838_v21 = vpack.c.bf16 %v60_v19, %v58_v18  ;;  %v57_v22 = vld [vmem:[%s1597_s1 + $0x60] sm:$0xff]  ;;  %v59_v23 = vld [vmem:[%s1597_s1 + $0x70] sm:$0xff]  ;;  %v62_v24 = vld [vmem:[%s1597_s1 + $0x88] sm:$0xff] }
  0x19   :  { %v64_v25 = vld [vmem:[%s1597_s1 + $0x98] sm:$0xff]  ;;  %v171_v26 = vld [vmem:[#allocation2 + $0x8] sm:$0xff]  ;;  %v840_v28 = vpack.c.bf16 %v59_v23, %v57_v22  ;;  %v61_v29 = vld [vmem:[%s1597_s1 + $0x80] sm:$0xff] }
  0x1a   :  { %v175_v27 = vld [vmem:[#allocation2 + $0x28] sm:$0xff]  ;;  %v170_v31 = vld [vmem:[#allocation2] sm:$0xff]  ;;  %v842_v32 = vpack.c.bf16 %v64_v25, %v62_v24  ;;  %v63_v33 = vld [vmem:[%s1597_s1 + $0x90] sm:$0xff] }
  0x1b   :  { %833 = vmatpush1.bf16.msra.mxu0 %v832_v14  ;;  %v858_v30 = vpack.c.bf16 %v175_v27, %v171_v26  ;;  %v66_v34 = vld [vmem:[%s1597_s1 + $0xa8] sm:$0xff]  ;;  %v174_v35 = vld [vmem:[#allocation2 + $0x20] sm:$0xff]  ;;  %v68_v36 = vld [vmem:[%s1597_s1 + $0xb8] sm:$0xff]  ;;  %v844_v43 = vpack.c.bf16 %v63_v33, %v61_v29 }
  0x1c   :  { %835 = vmatprep.subr.bf16.mxu0 %v834_v15  ;;  %v860_v37 = vpack.c.bf16 %v174_v35, %v170_v31  ;;  %v179_v38 = vld [vmem:[#allocation2 + $0x48] sm:$0xff]  ;;  %v178_v41 = vld [vmem:[#allocation2 + $0x40] sm:$0xff]  ;;  %v846_v47 = vpack.c.bf16 %v68_v36, %v66_v34  ;;  %v67_v48 = vld [vmem:[%s1597_s1 + $0xb0] sm:$0xff] }
  0x1d   :  { %859 = vmatprep.subr.bf16.mxu1 %v858_v30  ;;  %v183_v39 = vld [vmem:[#allocation2 + $0x68] sm:$0xff]  ;;  %v182_v42 = vld [vmem:[#allocation2 + $0x60] sm:$0xff]  ;;  %v72_v51 = vld [vmem:[%s1597_s1 + $0xd8] sm:$0xff] }
  0x1e   :  { %v862_v40 = vpack.c.bf16 %v183_v39, %v179_v38  ;;  %v65_v44 = vld [vmem:[%s1597_s1 + $0xa0] sm:$0xff]  ;;  %861 = vmatpush1.bf16.msra.mxu1 %v860_v37  ;;  %v864_v45 = vpack.c.bf16 %v182_v42, %v178_v41  ;;  %v187_v46 = vld [vmem:[#allocation2 + $0x88] sm:$0xff]  ;;  %v71_v59 = vld [vmem:[%s1597_s1 + $0xd0] sm:$0xff] }
  0x1f   :  { %837 = vmatpush1.bf16.msra.mxu0 %v836_v20  ;;  %v70_v49 = vld [vmem:[%s1597_s1 + $0xc8] sm:$0xff]  ;;  %v186_v53 = vld [vmem:[#allocation2 + $0x80] sm:$0xff]  ;;  %v848_v57 = vpack.c.bf16 %v67_v48, %v65_v44  ;;  %v76_v3 = vld [vmem:[%s1597_s1 + $0xf8] sm:$0xff] }
  0x20   :  { %839 = vmatprep.subr.bf16.mxu0 %v838_v21  ;;  %863 = vmatprep.subr.bf16.mxu1 %v862_v40  ;;  %v191_v50 = vld [vmem:[#allocation2 + $0xa8] sm:$0xff]  ;;  %v190_v54 = vld [vmem:[#allocation2 + $0xa0] sm:$0xff]  ;;  %v850_v61 = vpack.c.bf16 %v72_v51, %v70_v49  ;;  %v75_v8 = vld [vmem:[%s1597_s1 + $0xf0] sm:$0xff] }
  0x21   :  { %v866_v52 = vpack.c.bf16 %v191_v50, %v187_v46  ;;  %v195_v55 = vld [vmem:[#allocation2 + $0xc8] sm:$0xff]  ;;  %v69_v58 = vld [vmem:[%s1597_s1 + $0xc0] sm:$0xff]  ;;  %v868_v60 = vpack.c.bf16 %v190_v54, %v186_v53  ;;  %v173_v11 = vld [vmem:[#allocation2 + $0x18] sm:$0xff] }
  0x22   :  { %v199_v56 = vld [vmem:[#allocation2 + $0xe8] sm:$0xff]  ;;  %865 = vmatpush1.bf16.msra.mxu1 %v864_v45  ;;  %v194_v1 = vld [vmem:[#allocation2 + $0xc0] sm:$0xff]  ;;  %v852_v6 = vpack.c.bf16 %v71_v59, %v69_v58  ;;  %v177_v15 = vld [vmem:[#allocation2 + $0x38] sm:$0xff] }
  0x23   :  { %841 = vmatpush1.bf16.msra.mxu0 %v840_v28  ;;  %v74_v62 = vld [vmem:[%s1597_s1 + $0xe8] sm:$0xff]  ;;  %867 = vmatprep.subr.bf16.mxu1 %v866_v52  ;;  %v870_v63 = vpack.c.bf16 %v199_v56, %v195_v55  ;;  %v198_v2 = vld [vmem:[#allocation2 + $0xe0] sm:$0xff]  ;;  %v922_v20 = vpack.c.bf16 %v177_v15, %v173_v11  ;;  %v172_v21 = vld [vmem:[#allocation2 + $0x10] sm:$0xff] }
  0x24   :  { %843 = vmatprep.subr.bf16.mxu0 %v842_v32  ;;  %v203_v4 = vld [vmem:[#allocation2 + $0x108] sm:$0xff]  ;;  %v73_v7 = vld [vmem:[%s1597_s1 + $0xe0] sm:$0xff]  ;;  %v872_v9 = vpack.c.bf16 %v198_v2, %v194_v1  ;;  %v854_v10 = vpack.c.bf16 %v76_v3, %v74_v62  ;;  %v176_v22 = vld [vmem:[#allocation2 + $0x30] sm:$0xff] }
  0x25   :  { %v207_v5 = vld [vmem:[#allocation2 + $0x128] sm:$0xff]  ;;  %v202_v13 = vld [vmem:[#allocation2 + $0x100] sm:$0xff]  ;;  %v856_v18 = vpack.c.bf16 %v75_v8, %v73_v7  ;;  %v181_v23 = vld [vmem:[#allocation2 + $0x58] sm:$0xff]  ;;  %v924_v31 = vpack.c.bf16 %v176_v22, %v172_v21 }
  0x26   :  { %869 = vmatpush1.bf16.msra.mxu1 %v868_v60  ;;  %v874_v12 = vpack.c.bf16 %v207_v5, %v203_v4  ;;  %v206_v14 = vld [vmem:[#allocation2 + $0x120] sm:$0xff]  ;;  %v211_v16 = vld [vmem:[#allocation2 + $0x148] sm:$0xff]  ;;  %v185_v25 = vld [vmem:[#allocation2 + $0x78] sm:$0xff] }
  0x27   :  { %845 = vmatpush1.bf16.msra.mxu0 %v844_v43  ;;  %871 = vmatprep.subr.bf16.mxu1 %v870_v63  ;;  %v215_v17 = vld [vmem:[#allocation2 + $0x168] sm:$0xff]  ;;  %v876_v19 = vpack.c.bf16 %v206_v14, %v202_v13  ;;  %v210_v26 = vld [vmem:[#allocation2 + $0x140] sm:$0xff]  ;;  %v926_v32 = vpack.c.bf16 %v185_v25, %v181_v23  ;;  %v180_v33 = vld [vmem:[#allocation2 + $0x50] sm:$0xff] }
  0x28   :  { %847 = vmatprep.subr.bf16.mxu0 %v846_v47  ;;  %v878_v24 = vpack.c.bf16 %v215_v17, %v211_v16  ;;  %v214_v27 = vld [vmem:[#allocation2 + $0x160] sm:$0xff]  ;;  %v219_v28 = vld [vmem:[#allocation2 + $0x188] sm:$0xff]  ;;  %v184_v34 = vld [vmem:[#allocation2 + $0x70] sm:$0xff] }
  0x29   :  { %v223_v29 = vld [vmem:[#allocation2 + $0x1a8] sm:$0xff]  ;;  %v43_v30 = vld [vmem:[%s1596_s0] sm:$0xff]  ;;  %v189_v35 = vld [vmem:[#allocation2 + $0x98] sm:$0xff]  ;;  %v880_v36 = vpack.c.bf16 %v214_v27, %v210_v26  ;;  %v928_v44 = vpack.c.bf16 %v184_v34, %v180_v33 }
  0x2a   :  { %873 = vmatpush1.bf16.msra.mxu1 %v872_v9  ;;  %v193_v37 = vld [vmem:[#allocation2 + $0xb8] sm:$0xff]  ;;  %v882_v38 = vpack.c.bf16 %v223_v29, %v219_v28  ;;  %v218_v39 = vld [vmem:[#allocation2 + $0x180] sm:$0xff]  ;;  %v227_v41 = vld [vmem:[#allocation2 + $0x1c8] sm:$0xff] }
  0x2b   :  { %849 = vmatpush1.bf16.msra.mxu0 %v848_v57  ;;  %875 = vmatprep.subr.bf16.mxu1 %v874_v12  ;;  %v222_v40 = vld [vmem:[#allocation2 + $0x1a0] sm:$0xff]  ;;  %v231_v42 = vld [vmem:[#allocation2 + $0x1e8] sm:$0xff]  ;;  %v930_v45 = vpack.c.bf16 %v193_v37, %v189_v35  ;;  %v188_v46 = vld [vmem:[#allocation2 + $0x90] sm:$0xff] }
  0x2c   :  { %851 = vmatprep.subr.bf16.mxu0 %v850_v61  ;;  %v44_v43 = vld [vmem:[%s1596_s0 + $0x8] sm:$0xff]  ;;  %v192_v47 = vld [vmem:[#allocation2 + $0xb0] sm:$0xff]  ;;  %v197_v48 = vld [vmem:[#allocation2 + $0xd8] sm:$0xff]  ;;  %v884_v49 = vpack.c.bf16 %v222_v40, %v218_v39  ;;  %v886_v51 = vpack.c.bf16 %v231_v42, %v227_v41 }
  0x2d   :  { %v201_v50 = vld [vmem:[#allocation2 + $0xf8] sm:$0xff]  ;;  %v226_v52 = vld [vmem:[#allocation2 + $0x1c0] sm:$0xff]  ;;  %v239_v54 = vld [vmem:[#allocation2 + $0x228] sm:$0xff]  ;;  %v932_v55 = vpack.c.bf16 %v192_v47, %v188_v46 }
  0x2e   :  { %877 = vmatpush1.bf16.msra.mxu1 %v876_v19  ;;  %v230_v53 = vld [vmem:[#allocation2 + $0x1e0] sm:$0xff]  ;;  %v934_v56 = vpack.c.bf16 %v201_v50, %v197_v48  ;;  %v196_v57 = vld [vmem:[#allocation2 + $0xd0] sm:$0xff]  ;;  %v205_v59 = vld [vmem:[#allocation2 + $0x118] sm:$0xff] }
  0x2f   :  { %853 = vmatpush1.bf16.msra.mxu0 %v852_v6  ;;  %879 = vmatprep.subr.bf16.mxu1 %v878_v24  ;;  %v200_v58 = vld [vmem:[#allocation2 + $0xf0] sm:$0xff]  ;;  %v888_v60 = vpack.c.bf16 %v230_v53, %v226_v52  ;;  %v209_v61 = vld [vmem:[#allocation2 + $0x138] sm:$0xff]  ;;  %v234_v63 = vld [vmem:[#allocation2 + $0x200] sm:$0xff] }
  0x30   :  { %855 = vmatprep.subr.bf16.mxu0 %v854_v10  ;;  %v238_v1 = vld [vmem:[#allocation2 + $0x220] sm:$0xff]  ;;  %v243_v2 = vld [vmem:[#allocation2 + $0x248] sm:$0xff]  ;;  %v936_v4 = vpack.c.bf16 %v200_v58, %v196_v57  ;;  %v938_v5 = vpack.c.bf16 %v209_v61, %v205_v59  ;;  %v204_v6 = vld [vmem:[#allocation2 + $0x110] sm:$0xff] }
  0x31   :  { %v247_v3 = vld [vmem:[#allocation2 + $0x268] sm:$0xff]  ;;  %v208_v7 = vld [vmem:[#allocation2 + $0x130] sm:$0xff]  ;;  %v213_v8 = vld [vmem:[#allocation2 + $0x158] sm:$0xff]  ;;  %v892_v9 = vpack.c.bf16 %v238_v1, %v234_v63 }
  0x32   :  { %881 = vmatpush1.bf16.msra.mxu1 %v880_v36  ;;  %v217_v10 = vld [vmem:[#allocation2 + $0x178] sm:$0xff]  ;;  %v894_v11 = vpack.c.bf16 %v247_v3, %v243_v2  ;;  %v242_v12 = vld [vmem:[#allocation2 + $0x240] sm:$0xff]  ;;  %v251_v14 = vld [vmem:[#allocation2 + $0x288] sm:$0xff]  ;;  %v940_v16 = vpack.c.bf16 %v208_v7, %v204_v6 }
  0x33   :  { %857 = vmatpush1.bf16.msra.mxu0 %v856_v18  ;;  %883 = vmatprep.subr.bf16.mxu1 %v882_v38  ;;  %v246_v13 = vld [vmem:[#allocation2 + $0x260] sm:$0xff]  ;;  %v255_v15 = vld [vmem:[#allocation2 + $0x2a8] sm:$0xff]  ;;  %v942_v17 = vpack.c.bf16 %v217_v10, %v213_v8  ;;  %v212_v18 = vld [vmem:[#allocation2 + $0x150] sm:$0xff] }
  0x34   :  { %923 = vmatprep.subr.bf16.mxu0 %v922_v20  ;;  %v216_v19 = vld [vmem:[#allocation2 + $0x170] sm:$0xff]  ;;  %v221_v20 = vld [vmem:[#allocation2 + $0x198] sm:$0xff]  ;;  %v896_v21 = vpack.c.bf16 %v246_v13, %v242_v12  ;;  %v898_v23 = vpack.c.bf16 %v255_v15, %v251_v14  ;;  %v250_v24 = vld [vmem:[#allocation2 + $0x280] sm:$0xff] }
  0x35   :  { %v225_v22 = vld [vmem:[#allocation2 + $0x1b8] sm:$0xff]  ;;  %v254_v25 = vld [vmem:[#allocation2 + $0x2a0] sm:$0xff]  ;;  %v259_v26 = vld [vmem:[#allocation2 + $0x2c8] sm:$0xff]  ;;  %v944_v28 = vpack.c.bf16 %v216_v19, %v212_v18 }
  0x36   :  { %154 = vmatmul.mubr.f32.vlgmr.msra.gmra.mrb[0].mxu0 %v43_v30  ;;  %885 = vmatpush1.bf16.msra.mxu1 %v884_v49  ;;  %v263_v27 = vld [vmem:[#allocation2 + $0x2e8] sm:$0xff]  ;;  %v946_v29 = vpack.c.bf16 %v225_v22, %v221_v20  ;;  %v220_v30 = vld [vmem:[#allocation2 + $0x190] sm:$0xff]  ;;  %v900_v33 = vpack.c.bf16 %v254_v25, %v250_v24  ;;  %v233_v34 = vld [vmem:[#allocation2 + $0x1f8] sm:$0xff] }
  0x37   :  { %159 = vmatprep.mubr.f32.mxu0 %v1130_v0  ;;  %925 = vmatpush1.bf16.msra.mxu0 %v924_v31  ;;  %v235_v0 = vld [vmem:[#allocation2 + $0x208] sm:$0xff]  ;;  %v224_v31 = vld [vmem:[#allocation2 + $0x1b0] sm:$0xff]  ;;  %v902_v35 = vpack.c.bf16 %v263_v27, %v259_v26  ;;  %v258_v36 = vld [vmem:[#allocation2 + $0x2c0] sm:$0xff] }
  0x38   :  { %927 = vmatprep.subr.bf16.mxu0 %v926_v32  ;;  %887 = vmatprep.subr.bf16.mxu1 %v886_v51  ;;  %v890_v62 = vpack.c.bf16 %v239_v54, %v235_v0  ;;  %v229_v32 = vld [vmem:[#allocation2 + $0x1d8] sm:$0xff]  ;;  %v262_v37 = vld [vmem:[#allocation2 + $0x2e0] sm:$0xff]  ;;  %v267_v38 = vld [vmem:[#allocation2 + $0x308] sm:$0xff]  ;;  %v948_v40 = vpack.c.bf16 %v224_v31, %v220_v30 }
  0x39   :  { %v271_v39 = vld [vmem:[#allocation2 + $0x328] sm:$0xff]  ;;  %v950_v41 = vpack.c.bf16 %v233_v34, %v229_v32  ;;  %v228_v42 = vld [vmem:[#allocation2 + $0x1d0] sm:$0xff]  ;;  %v241_v46 = vld [vmem:[#allocation2 + $0x238] sm:$0xff] }
  0x3a   :  { %160 = vmatmul.mubr.f32.gmra.mrb[2].mxu0 %v44_v43  ;;  %889 = vmatpush1.bf16.msra.mxu1 %v888_v60  ;;  %v232_v43 = vld [vmem:[#allocation2 + $0x1f0] sm:$0xff]  ;;  %v906_v47 = vpack.c.bf16 %v271_v39, %v267_v38  ;;  %v266_v48 = vld [vmem:[#allocation2 + $0x300] sm:$0xff]  ;;  %v275_v50 = vld [vmem:[#allocation2 + $0x348] sm:$0xff] }
  0x3b   :  { %929 = vmatpush1.bf16.msra.mxu0 %v928_v44  ;;  %891 = vmatprep.subr.bf16.mxu1 %v890_v62  ;;  %v237_v44 = vld [vmem:[#allocation2 + $0x218] sm:$0xff]  ;;  %v270_v49 = vld [vmem:[#allocation2 + $0x320] sm:$0xff]  ;;  %v279_v51 = vld [vmem:[#allocation2 + $0x368] sm:$0xff]  ;;  %v952_v52 = vpack.c.bf16 %v232_v43, %v228_v42 }
  0x3c   :  { %931 = vmatprep.subr.bf16.mxu0 %v930_v45  ;;  %v904_v45 = vpack.c.bf16 %v262_v37, %v258_v36  ;;  %v954_v53 = vpack.c.bf16 %v241_v46, %v237_v44  ;;  %v236_v0 = vld [vmem:[#allocation2 + $0x210] sm:$0xff]  ;;  %v249_v57 = vld [vmem:[#allocation2 + $0x278] sm:$0xff]  ;;  %v910_v58 = vpack.c.bf16 %v279_v51, %v275_v50  ;;  %v274_v59 = vld [vmem:[#allocation2 + $0x340] sm:$0xff] }
  0x3d   :  { %v240_v54 = vld [vmem:[#allocation2 + $0x230] sm:$0xff]  ;;  %v278_v60 = vld [vmem:[#allocation2 + $0x360] sm:$0xff]  ;;  %v283_v61 = vld [vmem:[#allocation2 + $0x388] sm:$0xff] }
  0x3e   :  { %893 = vmatpush1.bf16.msra.mxu1 %v892_v9  ;;  %v287_v62 = vld [vmem:[#allocation2 + $0x3a8] sm:$0xff]  ;;  %v956_v63 = vpack.c.bf16 %v240_v54, %v236_v0  ;;  %v244_v2 = vld [vmem:[#allocation2 + $0x250] sm:$0xff]  ;;  %v257_v6 = vld [vmem:[#allocation2 + $0x2b8] sm:$0xff] }
  0x3f   :  { %933 = vmatpush1.bf16.msra.mxu0 %v932_v55  ;;  %895 = vmatprep.subr.bf16.mxu1 %v894_v11  ;;  %v245_v55 = vld [vmem:[#allocation2 + $0x258] sm:$0xff]  ;;  %v248_v3 = vld [vmem:[#allocation2 + $0x270] sm:$0xff]  ;;  %v914_v7 = vpack.c.bf16 %v287_v62, %v283_v61  ;;  %v282_v34 = vld [vmem:[#allocation2 + $0x380] sm:$0xff] }
  0x40   :  { %935 = vmatprep.subr.bf16.mxu0 %v934_v56  ;;  %v908_v56 = vpack.c.bf16 %v270_v49, %v266_v48  ;;  %v958_v1 = vpack.c.bf16 %v249_v57, %v245_v55  ;;  %v960_v8 = vpack.c.bf16 %v248_v3, %v244_v2  ;;  %v252_v10 = vld [vmem:[#allocation2 + $0x290] sm:$0xff]  ;;  %v261_v12 = vld [vmem:[#allocation2 + $0x2d8] sm:$0xff]  ;;  %v294_v46 = vld [vmem:[#allocation2 + $0x3e0] sm:$0xff]  ;;  %v79_v57 = vlaneseq }
  0x41   :  { %v256_v11 = vld [vmem:[#allocation2 + $0x2b0] sm:$0xff]  ;;  %v265_v13 = vld [vmem:[#allocation2 + $0x2f8] sm:$0xff]  ;;  %v538_v54 = vld [vmem:[%s1601_s5 + $0x180] sm:$0xff] }
  0x42   :  { %897 = vmatpush1.bf16.msra.mxu1 %v896_v21  ;;  %v964_v14 = vpack.c.bf16 %v256_v11, %v252_v10  ;;  %v966_v15 = vpack.c.bf16 %v265_v13, %v261_v12  ;;  %v269_v18 = vld [vmem:[#allocation2 + $0x318] sm:$0xff]  ;;  %v268_v22 = vld [vmem:[#allocation2 + $0x310] sm:$0xff]  ;;  %v539_v55 = vld [vmem:[%s1601_s5 + $0x188] sm:$0xff] }
  0x43   :  { %937 = vmatpush1.bf16.msra.mxu0 %v936_v4  ;;  %899 = vmatprep.subr.bf16.mxu1 %v898_v23  ;;  %v912_v4 = vpack.c.bf16 %v278_v60, %v274_v59  ;;  %v273_v19 = vld [vmem:[#allocation2 + $0x338] sm:$0xff]  ;;  %v272_v23 = vld [vmem:[#allocation2 + $0x330] sm:$0xff]  ;;  %v77_v60 = vld [vmem:[%s1598_s2] sm:$0x3] }
  0x44   :  { %939 = vmatprep.subr.bf16.mxu0 %v938_v5  ;;  %v253_v5 = vld [vmem:[#allocation2 + $0x298] sm:$0xff]  ;;  %v970_v21 = vpack.c.bf16 %v273_v19, %v269_v18  ;;  %v972_v26 = vpack.c.bf16 %v272_v23, %v268_v22  ;;  %v284_v36 = vld [vmem:[#allocation2 + $0x390] sm:$0xff]  ;;  %v490_v2 = vld [vmem:[%s1601_s5] sm:$0xff] }
  0x45   :  { %v962_v9 = vpack.c.bf16 %v257_v6, %v253_v5  ;;  %v277_v24 = vld [vmem:[#allocation2 + $0x358] sm:$0xff]  ;;  %v288_v38 = vld [vmem:[#allocation2 + $0x3b0] sm:$0xff]  ;;  %v491_v3 = vld [vmem:[%s1601_s5 + $0x8] sm:$0xff] }
  0x46   :  { %901 = vmatpush1.bf16.msra.mxu1 %v900_v33  ;;  %v281_v25 = vld [vmem:[#allocation2 + $0x378] sm:$0xff]  ;;  %v980_v39 = vpack.c.bf16 %v288_v38, %v284_v36  ;;  %v292_v49 = vld [vmem:[#allocation2 + $0x3d0] sm:$0xff]  ;;  %v522_v6 = vld [vmem:[%s1601_s5 + $0x100] sm:$0xff] }
  0x47   :  { %941 = vmatpush1.bf16.msra.mxu0 %v940_v16  ;;  %903 = vmatprep.subr.bf16.mxu1 %v902_v35  ;;  %v260_v16 = vld [vmem:[#allocation2 + $0x2d0] sm:$0xff]  ;;  %v974_v27 = vpack.c.bf16 %v281_v25, %v277_v24  ;;  %v285_v30 = vld [vmem:[#allocation2 + $0x398] sm:$0xff]  ;;  %v286_v35 = vld [vmem:[#allocation2 + $0x3a0] sm:$0xff] }
  0x48   :  { %943 = vmatprep.subr.bf16.mxu0 %v942_v17  ;;  %v264_v17 = vld [vmem:[#allocation2 + $0x2f0] sm:$0xff]  ;;  %v289_v31 = vld [vmem:[#allocation2 + $0x3b8] sm:$0xff]  ;;  %v916_v37 = vpack.c.bf16 %v286_v35, %v282_v34  ;;  %v494_v35 = vld [vmem:[%s1601_s5 + $0x20] sm:$0xff] }
  0x49   :  { %v968_v20 = vpack.c.bf16 %v264_v17, %v260_v16  ;;  %v978_v33 = vpack.c.bf16 %v289_v31, %v285_v30  ;;  %v293_v42 = vld [vmem:[#allocation2 + $0x3d8] sm:$0xff]  ;;  %v296_v50 = vld [vmem:[#allocation2 + $0x3f0] sm:$0xff]  ;;  %v543_v30 = vld [vmem:[%s1601_s5 + $0x1a8] sm:$0xff] }
  0x4a   :  { %905 = vmatpush1.bf16.msra.mxu1 %v904_v45  ;;  %v297_v44 = vld [vmem:[#allocation2 + $0x3f8] sm:$0xff]  ;;  %v290_v45 = vld [vmem:[#allocation2 + $0x3c0] sm:$0xff]  ;;  %v984_v51 = vpack.c.bf16 %v296_v50, %v292_v49  ;;  %v540_v11 = vld [vmem:[%s1601_s5 + $0x190] sm:$0xff] }
  0x4b   :  { %945 = vmatpush1.bf16.msra.mxu0 %v944_v28  ;;  %907 = vmatprep.subr.bf16.mxu1 %v906_v47  ;;  %v276_v28 = vld [vmem:[#allocation2 + $0x350] sm:$0xff]  ;;  %v982_v47 = vpack.c.bf16 %v297_v44, %v293_v42  ;;  %v920_v48 = vpack.c.bf16 %v294_v46, %v290_v45  ;;  %v509_v10 = vld [vmem:[%s1601_s5 + $0x98] sm:$0xff]  ;;  %v495_v36 = vld [vmem:[%s1601_s5 + $0x28] sm:$0xff] }
  0x4c   :  { %947 = vmatprep.subr.bf16.mxu0 %v946_v29  ;;  %v280_v29 = vld [vmem:[#allocation2 + $0x370] sm:$0xff]  ;;  %v541_v12 = vld [vmem:[%s1601_s5 + $0x198] sm:$0xff]  ;;  %v996_v45 = vpack.c.bf16 %v495_v36, %v494_v35 }
  0x4d   :  { %v976_v32 = vpack.c.bf16 %v280_v29, %v276_v28  ;;  %v492_v17 = vld [vmem:[%s1601_s5 + $0x10] sm:$0xff]  ;;  %v493_v18 = vld [vmem:[%s1601_s5 + $0x18] sm:$0xff]  ;;  %v1354_v23 = vpack.c.bf16 %v541_v12, %v540_v11  ;;  %v511_v28 = vld [vmem:[%s1601_s5 + $0xa8] sm:$0xff] }
  0x4e   :  { %909 = vmatpush1.bf16.msra.mxu1 %v908_v56  ;;  %v1308_v56 = vpack.c.bf16 %v539_v55, %v538_v54  ;;  %v524_v24 = vld [vmem:[%s1601_s5 + $0x110] sm:$0xff]  ;;  %v525_v25 = vld [vmem:[%s1601_s5 + $0x118] sm:$0xff]  ;;  %v542_v29 = vld [vmem:[%s1601_s5 + $0x1a0] sm:$0xff] }
  0x4f   :  { %949 = vmatpush1.bf16.msra.mxu0 %v948_v40  ;;  %911 = vmatprep.subr.bf16.mxu1 %v910_v58  ;;  %v291_v40 = vld [vmem:[#allocation2 + $0x3c8] sm:$0xff]  ;;  %v1311_v58 = vshrl.u32 %v79_v57, 7  ;;  %v1375_v34 = vpack.c.bf16 %v525_v25, %v524_v24  ;;  %v1384_v38 = vpack.c.bf16 %v543_v30, %v542_v29  ;;  %v513_v42 = vld [vmem:[%s1601_s5 + $0xb8] sm:$0xff]  ;;  %v546_v54 = vld [vmem:[%s1601_s5 + $0x1c0] sm:$0xff] }
  0x50   :  { %951 = vmatprep.subr.bf16.mxu0 %v950_v41  ;;  %v295_v41 = vld [vmem:[#allocation2 + $0x3e8] sm:$0xff]  ;;  %v545_v44 = vld [vmem:[%s1601_s5 + $0x1b8] sm:$0xff]  ;;  %v500_v11 = vld [vmem:[%s1601_s5 + $0x50] sm:$0xff] }
  0x51   :  { %v918_v43 = vpack.c.bf16 %v295_v41, %v291_v40  ;;  %v81_v59 = vsub.s32 0, %v1311_v58  ;;  %v85_v61 = vsub.s32 1, %v1311_v58  ;;  %v527_v40 = vld [vmem:[%s1601_s5 + $0x128] sm:$0xff]  ;;  %v512_v41 = vld [vmem:[%s1601_s5 + $0xb0] sm:$0xff]  ;;  %v501_v12 = vld [vmem:[%s1601_s5 + $0x58] sm:$0xff] }
  0x52   :  { %913 = vmatpush1.bf16.msra.mxu1 %v912_v4  ;;  %v998_v49 = vpack.c.bf16 %v513_v42, %v512_v41  ;;  %v547_v55 = vld [vmem:[%s1601_s5 + $0x1c8] sm:$0xff]  ;;  %v534_v30 = vld [vmem:[%s1601_s5 + $0x160] sm:$0xff]  ;;  %v521_v35 = vld [vmem:[%s1601_s5 + $0xf8] sm:$0xff] }
  0x53   :  { %953 = vmatpush1.bf16.msra.mxu0 %v952_v52  ;;  %915 = vmatprep.subr.bf16.mxu1 %v914_v7  ;;  %v506_v52 = vld [vmem:[%s1601_s5 + $0x80] sm:$0xff]  ;;  %v82_v62 = vrot.slane %v77_v60, %v81_v59  ;;  %v523_v7 = vld [vmem:[%s1601_s5 + $0x108] sm:$0xff]  ;;  %v553_v42 = vld [vmem:[%s1601_s5 + $0x1f8] sm:$0xff] }
  0x54   :  { %955 = vmatprep.subr.bf16.mxu0 %v954_v53  ;;  %v507_v53 = vld [vmem:[%s1601_s5 + $0x88] sm:$0xff]  ;;  %v1346_v16 = vpack.c.bf16 %v523_v7, %v522_v6  ;;  %v517_v6 = vld [vmem:[%s1601_s5 + $0xd8] sm:$0xff]  ;;  %v548_v7 = vld [vmem:[%s1601_s5 + $0x1d0] sm:$0xff] }
  0x55   :  { %v986_v0 = vpack.c.bf16 %v507_v53, %v506_v52  ;;  %v529_v52 = vld [vmem:[%s1601_s5 + $0x138] sm:$0xff]  ;;  %v514_v53 = vld [vmem:[%s1601_s5 + $0xc0] sm:$0xff] }
  0x56   :  { %917 = vmatpush1.bf16.msra.mxu1 %v916_v37 }
  0x57   :  { %957 = vmatpush1.bf16.msra.mxu0 %v956_v63  ;;  %919 = vmatprep.subr.bf16.mxu1 %v918_v43  ;;  %v86_v63 = vrot.slane %v77_v60, %v85_v61  ;;  %v544_v43 = vld [vmem:[%s1601_s5 + $0x1b0] sm:$0xff] }
  0x58   :  { %959 = vmatprep.subr.bf16.mxu0 %v958_v1  ;;  %v1414_v50 = vpack.c.bf16 %v545_v44, %v544_v43  ;;  %v536_v43 = vld [vmem:[%s1601_s5 + $0x170] sm:$0xff]  ;;  %v537_v44 = vld [vmem:[%s1601_s5 + $0x178] sm:$0xff] }
  0x5a   :  { %921 = vmatpush1.bf16.msra.mxu1 %v920_v48  ;;  %v497_v48 = vld [vmem:[%s1601_s5 + $0x38] sm:$0xff] }
  0x5b   :  { %961 = vmatpush1.bf16.msra.mxu0 %v960_v8  ;;  %987 = vmatprep.subr.bf16.mxu1 %v986_v0  ;;  %v508_v8 = vld [vmem:[%s1601_s5 + $0x90] sm:$0xff]  ;;  %v515_v0 = vld [vmem:[%s1601_s5 + $0xc8] sm:$0xff] }
  0x5c   :  { %963 = vmatprep.subr.bf16.mxu0 %v962_v9  ;;  %v990_v22 = vpack.c.bf16 %v509_v10, %v508_v8  ;;  %v549_v8 = vld [vmem:[%s1601_s5 + $0x1d8] sm:$0xff] }
  0x5f   :  { %965 = vmatpush1.bf16.msra.mxu0 %v964_v14 }
  0x60   :  { %967 = vmatprep.subr.bf16.mxu0 %v966_v15  ;;  %v988_v15 = vpack.c.bf16 %v491_v3, %v490_v2  ;;  %v1444_v2 = vpack.c.bf16 %v547_v55, %v546_v54  ;;  %v530_v3 = vld [vmem:[%s1601_s5 + $0x140] sm:$0xff] }
  0x63   :  { %969 = vmatpush1.bf16.msra.mxu0 %v968_v20 }
  0x64   :  { %971 = vmatprep.subr.bf16.mxu0 %v970_v21 }
  0x67   :  { %973 = vmatpush1.bf16.msra.mxu0 %v972_v26  ;;  %v510_v26 = vld [vmem:[%s1601_s5 + $0xa0] sm:$0xff] }
  0x68   :  { %975 = vmatprep.subr.bf16.mxu0 %v974_v27  ;;  %v994_v37 = vpack.c.bf16 %v511_v28, %v510_v26  ;;  %v502_v26 = vld [vmem:[%s1601_s5 + $0x60] sm:$0xff] }
  0x6b   :  { %977 = vmatpush1.bf16.msra.mxu0 %v976_v32 }
  0x6c   :  { %979 = vmatprep.subr.bf16.mxu0 %v978_v33  ;;  %v992_v33 = vpack.c.bf16 %v493_v18, %v492_v17  ;;  %v533_v17 = vld [vmem:[%s1601_s5 + $0x158] sm:$0xff]  ;;  %v518_v18 = vld [vmem:[%s1601_s5 + $0xe0] sm:$0xff] }
  0x6f   :  { %981 = vmatpush1.bf16.msra.mxu0 %v980_v39  ;;  %v526_v39 = vld [vmem:[%s1601_s5 + $0x120] sm:$0xff] }
  0x70   :  { %983 = vmatprep.subr.bf16.mxu0 %v982_v47  ;;  %v1405_v46 = vpack.c.bf16 %v527_v40, %v526_v39  ;;  %v496_v47 = vld [vmem:[%s1601_s5 + $0x30] sm:$0xff]  ;;  %v505_v39 = vld [vmem:[%s1601_s5 + $0x78] sm:$0xff] }
  0x71   :  { %v1000_v57 = vpack.c.bf16 %v497_v48, %v496_v47  ;;  %v552_v40 = vld [vmem:[%s1601_s5 + $0x1f0] sm:$0xff]  ;;  %v1543_v47 = vpack.c.bf16 %v537_v44, %v536_v43  ;;  %v310_v48 = vsub.s32 2, %v1311_v58 }
  0x73   :  { %985 = vmatpush1.bf16.msra.mxu0 %v984_v51  ;;  %v528_v51 = vld [vmem:[%s1601_s5 + $0x130] sm:$0xff] }
  0x74   :  { %1019 = vmatprep.subr.bf16.mxu0 %v1308_v56  ;;  %v1435_v60 = vpack.c.bf16 %v529_v52, %v528_v51  ;;  %v314_v51 = vsub.s32 3, %v1311_v58 }
 0x109   :  { %v155_v1 = vpop.f32.mrb[0].mxu0 }
 0x10a   :  { %v156_v4 = vadd.f32 %v155_v1, %v82_v62  ;;  %v157_v5 = vpop.f32.mrb[1].mxu0  ;;  %v1002_v1 = vpack.c.bf16 %v515_v0, %v514_v53 }
 0x10b   :  { %v158_v9 = vadd.f32 %v157_v5, %v86_v63  ;;  %v516_v5 = vld [vmem:[%s1601_s5 + $0xd0] sm:$0xff] }
 0x10c   :  { %v166_v19 = vmax.f32 %v156_v4, 0.0  ;;  %v531_v4 = vld [vmem:[%s1601_s5 + $0x148] sm:$0xff] }
 0x10d   :  { %v167_v13 = vmax.f32 %v158_v9, 0.0  ;;  %v161_v14 = vpop.f32.mrb[2].mxu0  ;;  %v1465_v10 = vpack.c.bf16 %v531_v4, %v530_v3 }
 0x10e   :  { %v162_v20 = vadd.f32 %v161_v14, %v82_v62  ;;  %v163_v21 = vpop.f32.mrb[3].mxu0  ;;  %v498_v62 = vld [vmem:[%s1601_s5 + $0x40] sm:$0xff]  ;;  %v1474_v14 = vpack.c.bf16 %v549_v8, %v548_v7 }
 0x10f   :  { %384 = vmatprep.mubr.f32.mxu1 %v167_v13  ;;  %461 = vmatprep.mubr.f32.mxu0 %v167_v13  ;;  %v164_v27 = vadd.f32 %v163_v21, %v86_v63  ;;  %v499_v63 = vld [vmem:[%s1601_s5 + $0x48] sm:$0xff]  ;;  %v1006_v13 = vpack.c.bf16 %v517_v6, %v516_v5 }
 0x110   :  { %385 = vmatmul.mubr.f32.vlgmr.msra.gmra.mrb[0].mxu1 %v166_v19  ;;  %462 = vmatmul.mubr.f32.vlgmr.msra.gmra.mrb[4].mxu0 %v166_v19  ;;  %v168_v31 = vmax.f32 %v162_v20, 0.0  ;;  %v1004_v9 = vpack.c.bf16 %v499_v63, %v498_v62  ;;  %v519_v19 = vld [vmem:[%s1601_s5 + $0xe8] sm:$0xff]  ;;  %v550_v20 = vld [vmem:[%s1601_s5 + $0x1e0] sm:$0xff] }
 0x111   :  { %v169_v32 = vmax.f32 %v164_v27, 0.0  ;;  %989 = vmatpush3.bf16.msra.mxu1 %v988_v15  ;;  %1021 = vmatpush3.bf16.msra.mxu0 %v1346_v16  ;;  %v532_v15 = vld [vmem:[%s1601_s5 + $0x150] sm:$0xff]  ;;  %v551_v21 = vld [vmem:[%s1601_s5 + $0x1e8] sm:$0xff]  ;;  %v1010_v25 = vpack.c.bf16 %v519_v19, %v518_v18 }
 0x112   :  { %991 = vmatprep.subr.bf16.mxu1 %v990_v22  ;;  %1023 = vmatprep.subr.bf16.mxu0 %v1354_v23  ;;  %v1008_v22 = vpack.c.bf16 %v501_v12, %v500_v11  ;;  %v1495_v24 = vpack.c.bf16 %v533_v17, %v532_v15  ;;  %v503_v27 = vld [vmem:[%s1601_s5 + $0x68] sm:$0xff]  ;;  %v1504_v28 = vpack.c.bf16 %v551_v21, %v550_v20 }
 0x113   :  { %390 = vmatprep.mubr.f32.mxu1 %v169_v32  ;;  %467 = vmatprep.mubr.f32.mxu0 %v169_v32  ;;  %v1012_v29 = vpack.c.bf16 %v503_v27, %v502_v26 }
 0x114   :  { %391 = vmatmul.mubr.f32.gmra.mrb[2].mxu1 %v168_v31  ;;  %468 = vmatmul.mubr.f32.gmra.mrb[6].mxu0 %v168_v31  ;;  %v535_v31 = vld [vmem:[%s1601_s5 + $0x168] sm:$0xff] }
 0x115   :  { %993 = vmatpush3.bf16.msra.mxu1 %v992_v33  ;;  %1025 = vmatpush3.bf16.msra.mxu0 %v1375_v34  ;;  %v1514_v32 = vpack.c.bf16 %v535_v31, %v534_v30  ;;  %v520_v33 = vld [vmem:[%s1601_s5 + $0xf0] sm:$0xff] }
 0x116   :  { %995 = vmatprep.subr.bf16.mxu1 %v994_v37  ;;  %1027 = vmatprep.subr.bf16.mxu0 %v1384_v38  ;;  %v1014_v36 = vpack.c.bf16 %v521_v35, %v520_v33  ;;  %v504_v37 = vld [vmem:[%s1601_s5 + $0x70] sm:$0xff] }
 0x117   :  { %v1016_v41 = vpack.c.bf16 %v505_v39, %v504_v37 }
 0x119   :  { %997 = vmatpush3.bf16.msra.mxu1 %v996_v45  ;;  %1029 = vmatpush3.bf16.msra.mxu0 %v1405_v46  ;;  %v1541_v45 = vpack.c.bf16 %v553_v42, %v552_v40 }
 0x11a   :  { %999 = vmatprep.subr.bf16.mxu1 %v998_v49  ;;  %1031 = vmatprep.subr.bf16.mxu0 %v1414_v50  ;;  %v298_v49 = vld [vmem:[%s1600_s4] sm:$0xf]  ;;  %s1131_s4 = smov [#allocation5]  }
 0x11b   :  { %v303_v52 = vrot.slane %v298_v49, %v81_v59  ;;  %v311_v53 = vrot.slane %v298_v49, %v310_v48  ;;  %v307_v0 = vrot.slane %v298_v49, %v85_v61  ;;  %v315_v54 = vrot.slane %v298_v49, %v314_v51  ;;  %s731_s5 = sshll.u32 %s1131_s4, 4  ;;  %s732_s5 = int_to_ptr.vmem [resolvable:$true] %s731_s5 }
 0x11c   :  { %s1101_s11 = scalar_lea.vmem %s732_s5, 1024  ;;  %p1106_p9 = scmp.lt.s32.totalorder %s732_s5, %s732_s5 }
 0x11d   :  { %1001 = vmatpush3.bf16.msra.mxu1 %v1000_v57  ;;  %1033 = vmatpush3.bf16.msra.mxu0 %v1435_v60  ;;  %p1102_p8 = scmp.ne.s32.totalorder %s732_s5, %s1101_s11  ;;  %p1107_p10 = scmp.lt.s32.totalorder %s1101_s11, %s1101_s11 }
 0x11e   :  { %1003 = vmatprep.subr.bf16.mxu1 %v1002_v1  ;;  %1035 = vmatprep.subr.bf16.mxu0 %v1444_v2 }
 0x11f   :  { %p1108_p11 = por %p1107_p10, %p1106_p9 }
 0x121   :  { %1005 = vmatpush3.bf16.msra.mxu1 %v1004_v9  ;;  %1037 = vmatpush3.bf16.msra.mxu0 %v1465_v10  ;;  %p1109_p12 = pnand %p1108_p11, %p1102_p8 }
 0x122   :  { %1007 = vmatprep.subr.bf16.mxu1 %v1006_v13  ;;  %1039 = vmatprep.subr.bf16.mxu0 %v1474_v14 }
 0x125   :  { %1009 = vmatpush3.bf16.msra.mxu1 %v1008_v22  ;;  %1041 = vmatpush3.bf16.msra.mxu0 %v1495_v24 }
 0x126   :  { %1011 = vmatprep.subr.bf16.mxu1 %v1010_v25  ;;  %1043 = vmatprep.subr.bf16.mxu0 %v1504_v28 }
 0x129   :  { %1013 = vmatpush3.bf16.msra.mxu1 %v1012_v29  ;;  %1045 = vmatpush3.bf16.msra.mxu0 %v1514_v32 }
 0x12a   :  { %1015 = vmatprep.subr.bf16.mxu1 %v1014_v36  ;;  %1047 = vmatprep.subr.bf16.mxu0 %v1541_v45 }
 0x12d   :  { %1017 = vmatpush3.bf16.msra.mxu1 %v1016_v41  ;;  %1049 = vmatpush3.bf16.msra.mxu0 %v1543_v47 }
 0x12e   :  { %1050 = vmatprep.subr.bf16.mxu1 %v1308_v56 }
 0x1e3   :  { %v386_v55 = vpop.f32.mrb[0].mxu1  ;;  %v463_v56 = vpop.f32.mrb[4].mxu0 }
 0x1e4   :  { %v387_v57 = vadd.f32 %v386_v55, %v303_v52  ;;  %v464_v62 = vadd.f32 %v463_v56, %v311_v53  ;;  %v388_v63 = vpop.f32.mrb[1].mxu1  ;;  %v465_v1 = vpop.f32.mrb[5].mxu0 }
 0x1e5   :  { %v389_v3 = vadd.f32 %v388_v63, %v307_v0  ;;  %v466_v4 = vadd.f32 %v465_v1, %v315_v54 }
 0x1e6   :  { %v474_v5 = vmax.f32 %v387_v57, 0.0  ;;  %v476_v6 = vmax.f32 %v464_v62, 0.0 }
 0x1e7   :  { %v475_v7 = vmax.f32 %v389_v3, 0.0  ;;  %v477_v8 = vmax.f32 %v466_v4, 0.0  ;;  %v392_v9 = vpop.f32.mrb[2].mxu1  ;;  %v469_v11 = vpop.f32.mrb[6].mxu0 }
 0x1e8   :  { %482 = vst [vmem:[#allocation5] sm:$0xff] %v474_v5  ;;  %484 = vst [vmem:[#allocation5 + $0x10] sm:$0xff] %v476_v6  ;;  %v393_v59 = vadd.f32 %v392_v9, %v303_v52  ;;  %v394_v58 = vpop.f32.mrb[3].mxu1  ;;  %v470_v61 = vadd.f32 %v469_v11, %v311_v53  ;;  %v471_v12 = vpop.f32.mrb[7].mxu0 }
 0x1e9   :  { %483 = vst [vmem:[#allocation5 + $0x8] sm:$0xff] %v475_v7  ;;  %485 = vst [vmem:[#allocation5 + $0x18] sm:$0xff] %v477_v8  ;;  %625 = vmatprep.mubr.f32.mxu1 %v475_v7  ;;  %700 = vmatprep.mubr.f32.mxu0 %v477_v8  ;;  %v395_v13 = vadd.f32 %v394_v58, %v307_v0  ;;  %v472_v15 = vadd.f32 %v471_v12, %v315_v54 }
 0x1ea   :  { %626 = vmatmul.mubr.f32.vlgmr.msra.gmra.mrb[4].mxu1 %v474_v5  ;;  %701 = vmatmul.mubr.f32.vlgmr.msra.gmra.mrb[8].mxu0 %v476_v6  ;;  %v478_v17 = vmax.f32 %v393_v59, 0.0  ;;  %v480_v18 = vmax.f32 %v470_v61, 0.0 }
 0x1eb   :  { %1058 = vmatpush3.bf16.msra.mxu1 %v1346_v16  ;;  %v479_v19 = vmax.f32 %v395_v13, 0.0  ;;  %v481_v20 = vmax.f32 %v472_v15, 0.0 }
 0x1ec   :  { %1051 = vmatprep.subr.bf16.mxu1 %v1354_v23  ;;  %486 = vst [vmem:[#allocation5 + $0x20] sm:$0xff] %v478_v17  ;;  %488 = vst [vmem:[#allocation5 + $0x30] sm:$0xff] %v480_v18 }
 0x1ed   :  { %487 = vst [vmem:[#allocation5 + $0x28] sm:$0xff] %v479_v19  ;;  %489 = vst [vmem:[#allocation5 + $0x38] sm:$0xff] %v481_v20  ;;  %630 = vmatprep.mubr.f32.mxu1 %v479_v19 }
 0x1ee   :  { %631 = vmatmul.mubr.f32.gmra.mrb[6].mxu1 %v478_v17 }
 0x1ef   :  { %1059 = vmatpush3.bf16.msra.mxu1 %v1375_v34  ;;  %705 = vmatprep.mubr.f32.mxu1 %v481_v20 }
 0x1f0   :  { %1052 = vmatprep.subr.bf16.mxu1 %v1384_v38 }
 0x1f3   :  { %1060 = vmatpush3.bf16.msra.mxu1 %v1405_v46 }
 0x1f4   :  { %1053 = vmatprep.subr.bf16.mxu1 %v1414_v50 }
 0x1f7   :  { %1061 = vmatpush3.bf16.msra.mxu1 %v1435_v60 }
 0x1f8   :  { %1054 = vmatprep.subr.bf16.mxu1 %v1444_v2 }
 0x1fb   :  { %1062 = vmatpush3.bf16.msra.mxu1 %v1465_v10 }
 0x1fc   :  { %1055 = vmatprep.subr.bf16.mxu1 %v1474_v14 }
 0x1ff   :  { %1063 = vmatpush3.bf16.msra.mxu1 %v1495_v24 }
 0x200   :  { %1056 = vmatprep.subr.bf16.mxu1 %v1504_v28 }
 0x203   :  { %1064 = vmatpush3.bf16.msra.mxu1 %v1514_v32 }
 0x204   :  { %1057 = vmatprep.subr.bf16.mxu1 %v1541_v45 }
 0x207   :  { %1065 = vmatpush3.bf16.msra.mxu1 %v1543_v47 }
 0x20a   :  { %706 = vmatmul.mubr.f32.vlgmr.msra.gmra.mrb[8].mxu1 %v480_v18 }
 0x20b   :  { %1112 = shalt.err (!%p1109_p12)
}
 0x20c   :  { %s1113_s13 = scalar_lea.hbm %s1603_s7, 1024 }
 0x20d   :  { %p1114_p13 = scmp.ne.s32.totalorder %s1603_s7, %s1113_s13  ;;  %p1117_p0 = scmp.lt.u32.totalorder %s1113_s13, %s1603_s7 }
 0x20f   :  { %p1119_p1 = pnand %p1117_p0, %p1114_p13 }
 0x211   :  { %1122 = shalt.err (!%p1119_p1)
}
 0x212   :  { %737 = dma.vmem_to_hbm [thread:$0]  %s732_s5, 1024, %s1603_s7, [#allocation4], %s1128_s15, %s1128_s15, %s1129_s16   ;;  %vm723_vm0 = vcmask 64512  }
 0x213   :  { %v747_v34 = vld [vmem:[%s1602_s6] ss:$0 sm:$0xff] }
 0x2bd   :  { %v782_v16 = vpop.f32.mrb[4].mxu1  ;;  %v820_v23 = vpop.f32.mrb[8].mxu0 }
 0x2be   :  { %v783_v38 = vpop.f32.mrb[5].mxu1  ;;  %v821_v46 = vpop.f32.mrb[9].mxu0 }
 0x2bf   :  { %v784_v50 = vadd.f32 %v783_v38, %v782_v16  ;;  %v822_v60 = vadd.f32 %v821_v46, %v820_v23 }
 0x2c1   :  { %v628_v2 = vadd.f32 %v784_v50, %v747_v34  ;;  %v785_v10 = vpop.f32.mrb[6].mxu1 }
 0x2c2   :  { %v786_v14 = vpop.f32.mrb[7].mxu1 }
 0x2c3   :  { %v703_v21 = vadd.f32 %v822_v60, %v628_v2  ;;  %v787_v22 = vadd.f32 %v786_v14, %v785_v10 }
 0x2c5   :  { %v748_v24 = vmul.f32 -1.442695, %v703_v21  ;;  %v633_v30 = vadd.f32 %v787_v22, %v747_v34 }
 0x2c7   :  { %1071 = vpow2.f32 %v748_v24 }
 0x2d1   :  { %v1072_v25 = vpop.eup %1071 }
 0x2d2   :  { %v717_v26 = vadd.f32 1.0, %v1072_v25 }
 0x2d4   :  { %1073 = vrcp.f32 %v717_v26 }
 0x2dd   :  { %v823_v27 = vpop.f32.mrb[8].mxu1 }
 0x2de   :  { %v1074_v28 = vpop.eup %1073  ;;  %v824_v29 = vpop.f32.mrb[9].mxu1 }
 0x2df   :  { %724 = vst.msk [vmem:[%s1604_s8] sm:$0xff] %vm723_vm0, %v1074_v28  ;;  %v825_v31 = vadd.f32 %v824_v29, %v823_v27 }
 0x2e1   :  { %v708_v32 = vadd.f32 %v825_v31, %v633_v30 }
 0x2e3   :  { %v749_v33 = vmul.f32 -1.442695, %v708_v32 }
 0x2e5   :  { %1075 = vpow2.f32 %v749_v33 }
 0x2ef   :  { %v1076_v35 = vpop.eup %1075 }
 0x2f0   :  { %v718_v36 = vadd.f32 1.0, %v1076_v35 }
 0x2f2   :  { %1077 = vrcp.f32 %v718_v36 }
 0x2fc   :  { %v1078_v37 = vpop.eup %1077 }
 0x2fd   :  { %725 = vst.msk [vmem:[%s1604_s8 + $0x8] sm:$0xff] %vm723_vm0, %v1078_v37 }
 0x2fe   :  { %1125 = dma.done.wait [#allocation4], 1024  }
 0x2ff   :  { %1126 = vsyncadd [#allocation4], 4294966272 }
 0x300   :  { %745 = vsyncpa [#allocation3], 1 }
 0x301   :  { %746 = vsyncpa [#allocation4], 1 }

</bundles_post_ra>
